<compile_context>
chip_gen: v7x
topology: tpu7x:2x2x1
jax: 0.10.0
libtpu: 0.0.40
codegen_flags: <defaults>
</compile_context>

<pallas_src>
import functools

import jax
import jax.numpy as jnp
from jax.experimental import pallas as pl
from jax.experimental.pallas import tpu as pltpu


def _round_up(x: int, m: int) -> int:
    return ((x + m - 1) // m) * m


def _conv_bn_relu_kernel(x_ref, w_ref, scale_ref, shift_ref, o_ref, *,
                         taps, c_in_blk, tile_l):
    """One (C_out-tile, batch, L-tile) grid step.

    x_ref     : (1, 1, tile_in, ch_tot)    bf16  input rows (+halo) for this tile
    w_ref     : (n_taps*c_in_blk, tile_co) bf16  per-tap weight slabs, stacked
    scale_ref : (1, tile_co) f32  folded BN scale = gamma / sqrt(var + eps)
    shift_ref : (1, tile_co) f32  folded BN shift = beta - mean * scale
    o_ref     : (1, tile_co, tile_l)       output tile, already NCL layout
    """
    def tap_dot(i):
        r, c = taps[i]                      # static row / channel offsets
        xs = x_ref[0, 0, r:r + tile_l, c:c + c_in_blk]
        ws = w_ref[i * c_in_blk:(i + 1) * c_in_blk, :]
        return jnp.dot(xs, ws, preferred_element_type=jnp.float32)

    acc = tap_dot(0)
    for i in range(1, len(taps)):           # short static unroll (K taps)
        acc = acc + tap_dot(i)

    # Fused BatchNorm (inference, folded) + ReLU in f32 on the accumulator,
    # then transpose the tile so the output is stored directly in NCL layout.
    y = jnp.maximum(acc * scale_ref[...] + shift_ref[...], 0.0)
    o_ref[0] = jnp.transpose(y).astype(o_ref.dtype)


def conv_norm_relu(x_ncl, weight, gamma, beta, running_mean, running_var,
                   *, stride: int = 1, padding: int = None, eps: float = 1e-5,
                   tile_l_max: int = 512, tile_co_max: int = 256,
                   out_dtype=jnp.bfloat16):
    """Forward pass matching ConvNormReLU (eval-mode BN, no fake quant).

    x_ncl  : (N, C_in, L)        PyTorch NCL input
    weight : (C_out, C_in, K)    Conv1d weight (bias=False, groups=1)
    returns: (N, C_out, L_out)   NCL output (bfloat16 by default)
    """
    n, c_in, l = x_ncl.shape
    c_out, c_in_w, k = weight.shape
    assert c_in == c_in_w, "groups != 1 not supported"
    s = stride
    if padding is None:
        padding = k // 2
    l_out = (l + 2 * padding - k) // s + 1

    # ---- channel tiling (lane-dense) ----
    c_out_p = _round_up(c_out, 128)
    tile_co = tile_co_max if c_out_p % tile_co_max == 0 else 128
    n_co = c_out_p // tile_co

    small_path = (k * c_in) <= 128
    if small_path:
        # Fold the whole K*C_in contraction into one 128-wide tap (wrapper im2col).
        n_taps = 1
        c_in_blk = _round_up(k * c_in, 128)          # == 128
        ch_tot = c_in_blk
        halo_pad = 0
    else:
        n_taps = k
        c_in_blk = _round_up(c_in, 128)
        ch_tot = s * c_in_blk                        # stride phases folded into lanes
        halo = (k - 1) // s
        halo_pad = _round_up(halo, 16) if halo else 0

    # ---- L tiling: lane-dense output tile (multiple of 128), shrink to fit VMEM ----
    tile_l_max = max(128, (tile_l_max // 128) * 128)
    tile_l = min(tile_l_max, _round_up(l_out, 128))
    out_bytes = jnp.dtype(out_dtype).itemsize

    def vmem_est(tl):
        tin = tl + halo_pad
        x_b = tin * ch_tot * 2
        w_b = n_taps * c_in_blk * tile_co * 2
        sc_b = 2 * tile_co * 4
        o_b = tile_co * tl * out_bytes
        live = tl * tile_co * 4 + tl * ch_tot * 2    # f32 acc + one tap slice
        return 2 * (x_b + w_b + sc_b + o_b) + live   # double-buffered pipeline

    VMEM_BUDGET = 40 * 1024 * 1024                   # safe for v7x 64 MiB physical
    while vmem_est(tile_l) > VMEM_BUDGET and tile_l > 128:
        tile_l = max(128, ((tile_l // 2) // 128) * 128)

    n_l = pl.cdiv(l_out, tile_l)
    lp = n_l * tile_l
    tile_in = tile_l + halo_pad

    # ---- wrapper glue (single pad/cast/layout pass over x; accepts NCL like the module) ----
    x_nlc = jnp.transpose(x_ncl, (0, 2, 1))                       # (N, L, C_in)

    if small_path:
        rows_needed = (lp - 1) * s + k
        l_in = max(rows_needed, padding + l)
        x_pad = jnp.pad(x_nlc, ((0, 0), (padding, l_in - padding - l), (0, 0)))
        cols = jnp.concatenate(
            [x_pad[:, t:t + (lp - 1) * s + 1:s, :] for t in range(k)], axis=-1)
        x_tiled = jnp.pad(cols, ((0, 0), (0, 0), (0, c_in_blk - k * c_in)))
        x_tiled = x_tiled.reshape(n, n_l, tile_l, ch_tot).astype(jnp.bfloat16)
        taps = ((0, 0),)
        w_flat = jnp.transpose(weight, (2, 1, 0)).reshape(k * c_in, c_out)
        w_flat = jnp.pad(w_flat, ((0, c_in_blk - k * c_in), (0, c_out_p - c_out)))
    else:
        rows_r = lp + halo_pad
        l_in = _round_up(max(rows_r * s, padding + l), s)
        x_pad = jnp.pad(x_nlc, ((0, 0), (padding, l_in - padding - l),
                                (0, c_in_blk - c_in)))
        # stride phases folded into the lane dim: row r, lane p*C_in_p+c <- x_pad[r*s+p, c]
        x_r = x_pad.reshape(n, l_in // s, ch_tot)
        # per-tile halo rows duplicated once in the wrapper (<= 16 rows/tile) so the
        # kernel needs only ONE input stream and no overlapping BlockSpecs.
        x_tiled = jnp.stack(
            [x_r[:, j * tile_l:j * tile_l + tile_in, :] for j in range(n_l)],
            axis=1).astype(jnp.bfloat16)                           # (N, n_l, tile_in, ch_tot)
        taps = tuple((t // s, (t % s) * c_in_blk) for t in range(k))
        w_kio = jnp.transpose(weight, (2, 1, 0))                   # (K, C_in, C_out)
        w_kio = jnp.pad(w_kio, ((0, 0), (0, c_in_blk - c_in), (0, c_out_p - c_out)))
        w_flat = w_kio.reshape(k * c_in_blk, c_out_p)
    w_flat = w_flat.astype(jnp.bfloat16)

    # folded BatchNorm (inference / running stats)
    scale = (gamma / jnp.sqrt(running_var + eps)).astype(jnp.float32)
    shift = (beta - running_mean * scale).astype(jnp.float32)
    scale2d = jnp.pad(scale, (0, c_out_p - c_out)).reshape(1, c_out_p)
    shift2d = jnp.pad(shift, (0, c_out_p - c_out)).reshape(1, c_out_p)

    kernel = functools.partial(_conv_bn_relu_kernel, taps=taps,
                               c_in_blk=c_in_blk, tile_l=tile_l)

    # Actual traffic: input re-streamed once per C_out tile, weights fetched once.
    cost = pl.CostEstimate(
        flops=int(2 * n * lp * n_taps * c_in_blk * c_out_p),
        transcendentals=0,
        bytes_accessed=int(n_co * x_tiled.size * 2
                           + w_flat.size * 2
                           + n * c_out_p * lp * out_bytes
                           + 2 * c_out_p * 4))

    out = pl.pallas_call(
        kernel,
        out_shape=jax.ShapeDtypeStruct((n, c_out_p, lp), out_dtype),
        grid_spec=pltpu.PrefetchScalarGridSpec(
            num_scalar_prefetch=0,
            # C_out-tile outermost -> weight slab stays VMEM-resident across (batch, L).
            grid=(n_co, n, n_l),
            in_specs=[
                pl.BlockSpec((1, 1, tile_in, ch_tot), lambda c, b, j: (b, j, 0, 0)),
                pl.BlockSpec((n_taps * c_in_blk, tile_co), lambda c, b, j: (0, c)),
                pl.BlockSpec((1, tile_co), lambda c, b, j: (0, c)),
                pl.BlockSpec((1, tile_co), lambda c, b, j: (0, c)),
            ],
            out_specs=pl.BlockSpec((1, tile_co, tile_l), lambda c, b, j: (b, c, j)),
        ),
        compiler_params=pltpu.CompilerParams(
            dimension_semantics=("parallel", "parallel", "parallel"),
            vmem_limit_bytes=48 * 1024 * 1024),
        cost_estimate=cost,
    )(x_tiled, w_flat, scale2d, shift2d)

    # Output is already NCL: just drop channel / L padding (no transpose pass).
    return out[:, :c_out, :l_out]


if __name__ == "__main__":
    # Small shapes consistent with the module: Conv1d on (N, C_in, L).
    N, C_IN, C_OUT, L, K, STRIDE = 2, 4, 8, 16, 3, 1

    key = jax.random.PRNGKey(0)
    k_x, k_w, k_g, k_b, k_m, k_v = jax.random.split(key, 6)

    x = jax.random.normal(k_x, (N, C_IN, L), dtype=jnp.float32)
    weight = jax.random.normal(k_w, (C_OUT, C_IN, K), dtype=jnp.float32) * 0.1
    gamma = 1.0 + 0.1 * jax.random.normal(k_g, (C_OUT,), dtype=jnp.float32)
    beta = 0.1 * jax.random.normal(k_b, (C_OUT,), dtype=jnp.float32)
    running_mean = 0.1 * jax.random.normal(k_m, (C_OUT,), dtype=jnp.float32)
    running_var = jnp.abs(jax.random.normal(k_v, (C_OUT,), dtype=jnp.float32)) + 0.5

    out = conv_norm_relu(x, weight, gamma, beta, running_mean, running_var,
                         stride=STRIDE)
    out = jax.block_until_ready(out)
    assert out.shape == (N, C_OUT, L), out.shape

    # Loose-tolerance check vs. a pure-JAX f32 reference (kernel math is bf16 on the MXU).
    ref = jax.lax.conv_general_dilated(
        x, weight, window_strides=(STRIDE,), padding=[(K // 2, K // 2)],
        dimension_numbers=("NCH", "OIH", "NCH"))
    ref = (ref - running_mean[None, :, None]) / jnp.sqrt(running_var + 1e-5)[None, :, None]
    ref = ref * gamma[None, :, None] + beta[None, :, None]
    ref = jnp.maximum(ref, 0.0)
    err = float(jnp.max(jnp.abs(out.astype(jnp.float32) - ref)))
    assert err < 5e-2, f"max abs err {err}"

    print("KERNEL_OK")
</pallas_src>

<mosaic_0001>
module attributes {stable_mosaic.version = 11 : i64} {
  func.func @_conv_bn_relu_kernel(%arg0: i32, %arg1: i32, %arg2: i32, %arg3: memref<1x1x128x128xbf16, #tpu.memory_space<vmem>>, %arg4: memref<128x128xbf16, #tpu.memory_space<vmem>>, %arg5: memref<1x128xf32, #tpu.memory_space<vmem>>, %arg6: memref<1x128xf32, #tpu.memory_space<vmem>>, %arg7: memref<1x128x128xbf16, #tpu.memory_space<vmem>>) attributes {dimension_semantics = [#tpu.dimension_semantics<parallel>, #tpu.dimension_semantics<parallel>, #tpu.dimension_semantics<parallel>], iteration_bounds = array<i64: 1, 2, 1>, scalar_prefetch = 0 : i64, scratch_operands = 0 : i64, tpu.core_type = #tpu.core_type<tc>, window_params = [{transform_indices = @transform_0, window_bounds = array<i64: 1, 1, 128, 128>}, {transform_indices = @transform_1, window_bounds = array<i64: 128, 128>}, {transform_indices = @transform_2, window_bounds = array<i64: 1, 128>}, {transform_indices = @transform_3, window_bounds = array<i64: 1, 128>}, {transform_indices = @transform_4, window_bounds = array<i64: 1, 128, 128>}]} {
    %c0 = arith.constant 0 : index
    %c0_0 = arith.constant 0 : index
    %c0_1 = arith.constant 0 : index
    %c0_2 = arith.constant 0 : index
    %0 = vector.load %arg3[%c0, %c0_0, %c0_1, %c0_2] : memref<1x1x128x128xbf16, #tpu.memory_space<vmem>>, vector<1x1x128x128xbf16>
    %1 = vector.shape_cast %0 : vector<1x1x128x128xbf16> to vector<128x128xbf16>
    %c0_3 = arith.constant 0 : index
    %c0_4 = arith.constant 0 : index
    %2 = vector.load %arg4[%c0_3, %c0_4] : memref<128x128xbf16, #tpu.memory_space<vmem>>, vector<128x128xbf16>
    %cst = arith.constant dense<0.000000e+00> : vector<128x128xf32>
    %3 = tpu.matmul %1, %2, %cst {dimension_numbers = #tpu.dot_dimension_numbers<[1], [0], [0], [1], [0, 0, 1, 1], [], []>} : vector<128x128xbf16>, vector<128x128xbf16>, vector<128x128xf32> -> vector<128x128xf32>
    %c0_5 = arith.constant 0 : index
    %c0_6 = arith.constant 0 : index
    %4 = vector.load %arg5[%c0_5, %c0_6] : memref<1x128xf32, #tpu.memory_space<vmem>>, vector<1x128xf32>
    %5 = vector.broadcast %4 : vector<1x128xf32> to vector<128x128xf32>
    %6 = arith.mulf %3, %5 : vector<128x128xf32>
    %c0_7 = arith.constant 0 : index
    %c0_8 = arith.constant 0 : index
    %7 = vector.load %arg6[%c0_7, %c0_8] : memref<1x128xf32, #tpu.memory_space<vmem>>, vector<1x128xf32>
    %8 = vector.broadcast %7 : vector<1x128xf32> to vector<128x128xf32>
    %9 = arith.addf %6, %8 : vector<128x128xf32>
    %cst_9 = arith.constant 0.000000e+00 : f32
    %10 = vector.broadcast %cst_9 : f32 to vector<128x128xf32>
    %11 = arith.maximumf %9, %10 : vector<128x128xf32>
    %12 = tpu.transpose %11, [1, 0] : vector<128x128xf32> -> vector<128x128xf32>
    %13 = arith.truncf %12 : vector<128x128xf32> to vector<128x128xbf16>
    %c0_10 = arith.constant 0 : index
    %c0_11 = arith.constant 0 : index
    %c0_12 = arith.constant 0 : index
    %14 = vector.load %arg7[%c0_10, %c0_11, %c0_12] : memref<1x128x128xbf16, #tpu.memory_space<vmem>>, vector<1x128x128xbf16>
    %15 = vector.shape_cast %14 : vector<1x128x128xbf16> to vector<128x128xbf16>
    %16 = vector.shape_cast %13 : vector<128x128xbf16> to vector<1x128x128xbf16>
    tpu.vector_store %arg7[%c0_10, %c0_11, %c0_12], %16 {strides = array<i32>} : memref<1x128x128xbf16, #tpu.memory_space<vmem>>, vector<1x128x128xbf16>,
    return
  }
  func.func @transform_0(%arg0: i32, %arg1: i32, %arg2: i32) -> (i32, i32, i32, i32) {
    %c0_i32 = arith.constant 0 : i32
    %c0_i32_0 = arith.constant 0 : i32
    %c0_i32_1 = arith.constant 0 : i32
    return %arg1, %arg2, %c0_i32, %c0_i32_0 : i32, i32, i32, i32
  }
  func.func @transform_1(%arg0: i32, %arg1: i32, %arg2: i32) -> (i32, i32) {
    %c0_i32 = arith.constant 0 : i32
    %c0_i32_0 = arith.constant 0 : i32
    return %c0_i32, %arg0 : i32, i32
  }
  func.func @transform_2(%arg0: i32, %arg1: i32, %arg2: i32) -> (i32, i32) {
    %c0_i32 = arith.constant 0 : i32
    %c0_i32_0 = arith.constant 0 : i32
    return %c0_i32, %arg0 : i32, i32
  }
  func.func @transform_3(%arg0: i32, %arg1: i32, %arg2: i32) -> (i32, i32) {
    %c0_i32 = arith.constant 0 : i32
    %c0_i32_0 = arith.constant 0 : i32
    return %c0_i32, %arg0 : i32, i32
  }
  func.func @transform_4(%arg0: i32, %arg1: i32, %arg2: i32) -> (i32, i32, i32) {
    %c0_i32 = arith.constant 0 : i32
    return %arg1, %arg0, %arg2 : i32, i32, i32
  }
}

</mosaic_0001>

<bundles_post_ra>
// kernel: tpu_custom_call.1
= control target key start
LH: loop header
LB: loop body
LE: loop exit
PB: predicated region body
PF: predicated region fallthrough
CT: control target
= control target key end

     0   :  { %9 = vsyncpa [#allocation3], 0  ;;  %s1583_s0 = inlined_call_operand.hbm [shape: bf16[2,1,128,128], index: 0, kind: input, shape index: {}]   ;;  %s1584_s1 = inlined_call_operand.hbm [shape: bf16[128,128], index: 1, kind: input, shape index: {}]   ;;  %s1585_s2 = inlined_call_operand.vmem [shape: f32[1,128], index: 2, kind: input, shape index: {}]   ;;  %s1586_s3 = inlined_call_operand.vmem [shape: f32[1,128], index: 3, kind: input, shape index: {}]   ;;  %s1587_s4 = inlined_call_operand.hbm [shape: bf16[2,128,128], index: 4, kind: output, shape index: {}]  }
   0x1   :  { %11 = vsyncpa [#allocation3 + $0x1], 0 }
   0x2   :  { %12 = vsyncpa [#allocation6], 0 }
   0x3   :  { %13 = vsyncpa [#allocation4], 0 }
   0x4   :  { %15 = vsyncpa [#allocation4 + $0x1], 0  ;;  %s1291_s15 = smov 0   ;;  %s1293_s16 = smov 0  }
   0x5   :  { %s1295_s17 = smov 0   ;;  %s1297_s18 = smov 0  }
   0x6   :  { %s1299_s19 = smov 0   ;;  %s1301_s20 = smov 0  }
   0x7 LB: > { %s838_s21 = sadd.s32 4294967295, %s1257_s20   ;;  %s839_s22 = sadd.s32 4294967294, %s1257_s20   ;;  %s1257_s20 = sphi %s1301_s20, %s21_s20   ;;  %s1253_s19 = sphi %s1299_s19, %s1611_s19   ;;  %s1249_s18 = sphi %s1297_s18, %s1610_s18   ;;  %s1245_s17 = sphi %s1295_s17, %s1609_s17   ;;  %s1241_s16 = sphi %s1293_s16, %s1608_s16   ;;  %s1237_s15 = sphi %s1291_s15, %s1607_s15  }
   0x8   : > { %p62_p0 = scmp.ne.s32.totalorder %s1241_s16, %s1237_s15  ;;  %p1325_p1 = scmp.eq.s32.totalorder %s838_s21, 0 }
   0x9   : > { %p1329_p2 = scmp.eq.s32.totalorder %s838_s21, 1  ;;  %p174_p3 = scmp.eq.s32.totalorder %s839_s22, 1 }
   0xa   : > { %s1592_s23 = scalar_select %p1325_p1, 1, 0 }
   0xb   : > { %s1593_s24 = scalar_select %p1329_p2, 1, 0 }
   0xc   : > { %p1335_p4 = por %p1325_p1, %p62_p0  ;;  %p840_p5 = scmp.ge.s32.totalorder %s1257_s20, 1 }
   0xd   : > { %p1340_p6 = por %p174_p3, %p62_p0  ;;  %p181_p7 = scmp.lt.s32.totalorder %s1257_s20, 3 }
   0xe   : > { %s1594_s25 = scalar_select %p1335_p4, 1, 0 }
   0xf   : > { %s1595_s26 = scalar_select %p1340_p6, 1, 0 }
  0x10   : > { %p1345_p8 = pnand %p840_p5, %p181_p7  ;;  %s1259_s28 = smov [#allocation5]  }
  0x11   : > { %s195_s29 = sshll.u32 %s1259_s28, 4  ;;  %s36_s5 = sadd.s32 1, %s1253_s19  ;;  %s196_s29 = int_to_ptr.vmem [resolvable:$true] %s195_s29 }
  0x12   : > { %s1596_s27 = scalar_select %p1345_p8, 1, 0 }
  0x13   : > { %p1028_p9 = pneg %p1345_p8  ;;  %s1113_s8 = scalar_lea.hbm %s1584_s1, 1024 }
  0x14   : > { %p1114_p12 = scmp.ne.s32.totalorder %s1584_s1, %s1113_s8  ;;  %p1120_p5 = scmp.lt.u32.totalorder %s1113_s8, %s1584_s1 }
  0x15   : > { %p1354_p11 = pnand %p1028_p9, %p1325_p1 }
  0x17   : > { %p1115_p13 = pneg %p1354_p11 }
  0x19   : > { %p1116_p0 = pnand %p1115_p13, %p1114_p12 }
  0x1b   : > { %p1117_p3 = pneg %p1116_p0 }
  0x1d   : > { %p1122_p7 = pnand %p1120_p5, %p1117_p3 }
  0x1f   : > { %1125 = shalt.err (!%p1122_p7)
}
  0x20   : > { %s1126_s13 = scalar_lea.vmem %s196_s29, 1024  ;;  %p1134_p1 = scmp.lt.s32.totalorder %s196_s29, %s196_s29 }
  0x21   : > { %p1127_p9 = scmp.ne.s32.totalorder %s196_s29, %s1126_s13  ;;  %p1135_p4 = scmp.lt.s32.totalorder %s1126_s13, %s1126_s13 }
  0x23   : > { %p1129_p10 = pnand %p1127_p9, %p1115_p13  ;;  %p1136_p8 = por %p1135_p4, %p1134_p1 }
  0x25   : > { %p1130_p6 = pneg %p1129_p10 }
  0x27   : > { %p1137_p2 = pnand %p1136_p8, %p1130_p6 }
  0x29   : > { %1140 = shalt.err (!%p1137_p2)
}
  0x2a   : > { %s1260_s14 = smov 64   ;;  %s1261_s21 = smov 4  }
  0x2b   : > { %1031 = dma.hbm_to_vmem [thread:$0]  (!%p1354_p11), %s1584_s1, 1024, %s196_s29, [#allocation6], %s1260_s14, %s1260_s14, %s1261_s21  }
  0x2c   : > { %p38_p1 = scmp.ge.s32.totalorder %s36_s5, 2  ;;  %s49_s6 = sadd.s32 1, %s1245_s17 }
  0x2d   : > { %p56_p2 = scmp.ne.s32.totalorder %s1245_s17, %s1241_s16  ;;  %p57_p4 = scmp.eq.s32.totalorder %s1257_s20, 0 }
  0x2e   : > { %s1613_s5 = smov (%p38_p1, %s36_s5), 0  ;;  %p1599_p8 = scmp.ne.s32.totalorder %s1593_s24, 0 }
  0x2f   : > { %p1384_p6 = por %p57_p4, %p56_p2  ;;  %s44_s8 = ssub.s32 %s1253_s19, %s1613_s5 }
  0x30   : > { %p1390_p10 = por %p1599_p8, %p56_p2  ;;  %p1041_p12 = scmp.lt.s32.totalorder %s1257_s20, 2 }
  0x31   : > { %p47_p11 = scmp.eq.s32.totalorder %s44_s8, 0  ;;  %s221_s29 = sand.u32 1, %s1245_s17  }
  0x32   : > { %s845_s9 = sshll.u32 %s221_s29, 6  ;;  %s891_s11 = sshll.u32 %s1253_s19, 10 }
  0x33   : > { %s1399_s10 = scalar_select %p47_p11, %s1245_s17, %s49_s6  }
  0x34   : > { %s1405_s22 = scalar_lea.hbm %s1583_s0, %s891_s11  ;;  %s225_s24 = scalar_lea.vmem [#allocation2], %s845_s9 }
  0x35   : > { %s234_s28 = sshll.u32 %s225_s24, 4  ;;  %p1411_p13 = pnand %p1041_p12, %p1384_p6  ;;  %s1407_s28 = int_to_ptr.vmem [resolvable:$true] %s234_s28 }
  0x36   : > { %s1415_s6 = scalar_lea.sflag [#allocation3], %s221_s29  ;;  %s1141_s12 = scalar_lea.hbm %s1405_s22, 1024 }
  0x37   : > { %p1142_p0 = scmp.ne.s32.totalorder %s1405_s22, %s1141_s12  ;;  %p1143_p3 = pneg %p1411_p13 }
  0x38   : > { %s1146_s7 = scalar_lea.hbm %s1583_s0, 2048  ;;  %p1147_p9 = scmp.lt.u32.totalorder %s1405_s22, %s1583_s0 }
  0x39   : > { %p1144_p5 = pnand %p1143_p3, %p1142_p0  ;;  %p1148_p1 = scmp.lt.u32.totalorder %s1146_s7, %s1141_s12 }
  0x3a   : > { %p1150_p4 = scmp.lt.u32.totalorder %s1141_s12, %s1405_s22 }
  0x3b   : > { %p1145_p7 = pneg %p1144_p5  ;;  %p1149_p2 = por %p1148_p1, %p1147_p9 }
  0x3d   : > { %p1151_p6 = por %p1150_p4, %p1149_p2 }
  0x3f   : > { %p1152_p8 = pnand %p1151_p6, %p1145_p7 }
  0x41   : > { %1155 = shalt.err (!%p1152_p8)
}
  0x42   : > { %s1156_s29 = scalar_lea.vmem %s1407_s28, 1024  ;;  %s1262_s9 = smov [#allocation2]  }
  0x43   : > { %p1157_p12 = scmp.ne.s32.totalorder %s1407_s28, %s1156_s29  ;;  %s1161_s11 = sshll.u32 %s1262_s9, 4  ;;  %s1162_s11 = int_to_ptr.vmem [resolvable:$false] %s1161_s11 }
  0x44   : > { %s1163_s13 = scalar_lea.vmem %s1162_s11, 2048  ;;  %p1164_p5 = scmp.lt.s32.totalorder %s1407_s28, %s1162_s11 }
  0x45   : > { %p1159_p11 = pnand %p1157_p12, %p1143_p3  ;;  %p1165_p9 = scmp.lt.s32.totalorder %s1163_s13, %s1156_s29 }
  0x47   : > { %p1160_p0 = pneg %p1159_p11  ;;  %p1166_p1 = por %p1165_p9, %p1164_p5 }
  0x49   : > { %p1167_p2 = pnand %p1166_p1, %p1160_p0 }
  0x4b   : > { %1170 = shalt.err (!%p1167_p2)
}
  0x4c   : > { %1035 = dma.hbm_to_vmem [thread:$0]  (!%p1411_p13), %s1405_s22, 1024, %s1407_s28, %s1415_s6, %s1260_s14, %s1260_s14, %s1261_s21  }
  0x4d   : > { %p1602_p3 = scmp.ne.s32.totalorder %s1596_s27, 0 }
  0x4e   : > { %s1449_s12 = sand.u32 (!%p1602_p3), 1, %s1241_s16   ;;  %p1603_p7 = scmp.ne.s32.totalorder (!%p1602_p3), %s1594_s25, 0 }
  0x4f   : > { %246 = sbr.rel (%p1602_p3) target bundleno = 548 (0x224), region = 36  ;;  %s849_s7 = sshll.u32 (!%p1602_p3), %s1449_s12, 6 }
  0x50   : > { %s249_s24 = scalar_lea.sflag (!%p1602_p3), [#allocation3], %s1449_s12  ;;  %s1455_s8 = scalar_lea.vmem (!%p1602_p3), [#allocation2], %s849_s7 }
  0x56   : > { %1224 = dma.done.wait (%p1603_p7), %s249_s24, 1024  }
  0x57   : > { %1226 = vsyncadd (%p1603_p7), %s249_s24, 4294966272  ;;  %p1604_p13 = scmp.ne.s32.totalorder %s1592_s23, 0 }
  0x59   : > { %1228 = dma.done.wait (%p1604_p13), [#allocation6], 1024  }
  0x5a   : > { %1230 = vsyncadd (%p1604_p13), [#allocation6], 4294966272  ;;  %v1097_v0 = vld [vmem:[#allocation5] sm:$0xff]   ;;  %v1098_v1 = vld [vmem:[#allocation5 + $0x8] sm:$0xff]   ;;  %s1517_s21 = scalar_lea.vmem [#allocation7], %s849_s7  ;;  %s908_s28 = sshll.u32 %s1249_s18, 10 }
  0x5b   : > { %972 = vmatprep.subr.bf16.mxu0 %v1097_v0  ;;  %1004 = vmatprep.subr.bf16.mxu1 %v1097_v0  ;;  %v1099_v2 = vld [vmem:[#allocation5 + $0x10] sm:$0xff]   ;;  %v1100_v3 = vld [vmem:[#allocation5 + $0x18] sm:$0xff]   ;;  %v1105_v4 = vld [vmem:[%s1455_s8] sm:$0xff]   ;;  %s711_s22 = sshll.u32 %s1517_s21, 4  ;;  %s1533_s9 = scalar_lea.hbm %s1587_s4, %s908_s28  ;;  %s1528_s22 = int_to_ptr.vmem [resolvable:$true] %s711_s22 }
  0x5c   : > { %973 = vmatpush3.bf16.msra.mxu0 %v1097_v0  ;;  %1012 = vmatpush3.bf16.msra.mxu1 %v1097_v0  ;;  %v1101_v5 = vld [vmem:[#allocation5 + $0x20] sm:$0xff]   ;;  %v1102_v7 = vld [vmem:[#allocation5 + $0x28] sm:$0xff]   ;;  %v1103_v8 = vld [vmem:[#allocation5 + $0x30] sm:$0xff]   ;;  %s695_s11 = scalar_lea.sflag [#allocation4], %s1449_s12  ;;  %s1171_s13 = scalar_lea.vmem %s1528_s22, 1024 }
  0x5d   : > { %974 = vmatprep.subr.bf16.mxu0 %v1098_v1  ;;  %1005 = vmatprep.subr.bf16.mxu1 %v1098_v1  ;;  %v1109_v6 = vld [vmem:[%s1455_s8 + $0x20] sm:$0xff]   ;;  %v1104_v9 = vld [vmem:[#allocation5 + $0x38] sm:$0xff]   ;;  %v1106_v10 = vld [vmem:[%s1455_s8 + $0x8] sm:$0xff]   ;;  %p1172_p4 = scmp.ne.s32.totalorder %s1528_s22, %s1171_s13  ;;  %s1263_s18 = smov [#allocation7]  }
  0x5e   : > { %988 = vmatprep.mubr.bf16.mxu0 %v1105_v4  ;;  %996 = vmatprep.mubr.bf16.mxu1 %v1109_v6  ;;  %v1110_v11 = vld [vmem:[%s1455_s8 + $0x28] sm:$0xff]   ;;  %v1107_v12 = vld [vmem:[%s1455_s8 + $0x10] sm:$0xff]   ;;  %v1108_v14 = vld [vmem:[%s1455_s8 + $0x18] sm:$0xff]   ;;  %s1175_s7 = sshll.u32 %s1263_s18, 4  ;;  %s1176_s7 = int_to_ptr.vmem [resolvable:$false] %s1175_s7 }
  0x5f   : > { %v1111_v13 = vld [vmem:[%s1455_s8 + $0x30] sm:$0xff]   ;;  %v1112_v15 = vld [vmem:[%s1455_s8 + $0x38] sm:$0xff]   ;;  %v1476_v16 = vld [vmem:[%s1585_s2] ss:$0 sm:$0xff]  ;;  %p1173_p6 = pnand %p1172_p4, %p1390_p10  ;;  %s1177_s24 = scalar_lea.vmem %s1176_s7, 2048 }
  0x60   : > { %975 = vmatpush3.bf16.msra.mxu0 %v1098_v1  ;;  %1013 = vmatpush3.bf16.msra.mxu1 %v1098_v1  ;;  %v1481_v20 = vld [vmem:[%s1586_s3] ss:$0 sm:$0xff]  ;;  %p1178_p12 = scmp.lt.s32.totalorder %s1528_s22, %s1176_s7  ;;  %p1179_p11 = scmp.lt.s32.totalorder %s1177_s24, %s1171_s13 }
  0x61   : > { %976 = vmatprep.subr.bf16.mxu0 %v1099_v2  ;;  %1006 = vmatprep.subr.bf16.mxu1 %v1099_v2  ;;  %p1174_p8 = pneg %p1173_p6 }
  0x62   : > { %p1180_p0 = por %p1179_p11, %p1178_p12 }
  0x64   : > { %977 = vmatpush3.bf16.msra.mxu0 %v1099_v2  ;;  %1014 = vmatpush3.bf16.msra.mxu1 %v1099_v2  ;;  %p1181_p5 = pnand %p1180_p0, %p1174_p8 }
  0x65   : > { %978 = vmatprep.subr.bf16.mxu0 %v1100_v3  ;;  %1007 = vmatprep.subr.bf16.mxu1 %v1100_v3 }
  0x68   : > { %979 = vmatpush3.bf16.msra.mxu0 %v1100_v3  ;;  %1015 = vmatpush3.bf16.msra.mxu1 %v1100_v3 }
  0x69   : > { %980 = vmatprep.subr.bf16.mxu0 %v1101_v5  ;;  %1008 = vmatprep.subr.bf16.mxu1 %v1101_v5 }
  0x6c   : > { %981 = vmatpush3.bf16.msra.mxu0 %v1101_v5  ;;  %1016 = vmatpush3.bf16.msra.mxu1 %v1101_v5 }
  0x6d   : > { %982 = vmatprep.subr.bf16.mxu0 %v1102_v7  ;;  %1009 = vmatprep.subr.bf16.mxu1 %v1102_v7 }
  0x70   : > { %983 = vmatpush3.bf16.msra.mxu0 %v1102_v7  ;;  %1017 = vmatpush3.bf16.msra.mxu1 %v1102_v7 }
  0x71   : > { %984 = vmatprep.subr.bf16.mxu0 %v1103_v8  ;;  %1010 = vmatprep.subr.bf16.mxu1 %v1103_v8 }
  0x74   : > { %985 = vmatpush3.bf16.msra.mxu0 %v1103_v8  ;;  %1018 = vmatpush3.bf16.msra.mxu1 %v1103_v8 }
  0x75   : > { %986 = vmatprep.subr.bf16.mxu0 %v1104_v9  ;;  %1011 = vmatprep.subr.bf16.mxu1 %v1104_v9 }
  0x78   : > { %987 = vmatpush3.bf16.msra.mxu0 %v1104_v9  ;;  %1019 = vmatpush3.bf16.msra.mxu1 %v1104_v9 }
  0x7b   : > { %989 = vmatmul.mubr.bf16.vlgmr.msra.gmra.mrb[0].mxu0 %v1106_v10  ;;  %997 = vmatmul.mubr.bf16.vlgmr.msra.gmra.mrb[0].mxu1 %v1110_v11 }
  0x7c   : > { %992 = vmatprep.mubr.bf16.mxu0 %v1107_v12  ;;  %1000 = vmatprep.mubr.bf16.mxu1 %v1111_v13 }
  0x83   : > { %993 = vmatmul.mubr.bf16.gmra.mrb[4].mxu0 %v1108_v14  ;;  %1001 = vmatmul.mubr.bf16.gmra.mrb[4].mxu1 %v1112_v15 }
 0x14e   : > { %v990_v17 = vpop.f32.mrb[0].mxu0  ;;  %v998_v18 = vpop.f32.mrb[0].mxu1 }
 0x14f   : > { %v457_v19 = vpop.f32.mrb[1].mxu0  ;;  %v489_v21 = vpop.f32.mrb[1].mxu1  ;;  %v529_v29 = vmul.f32 %v990_v17, %v1476_v16  ;;  %v537_v62 = vmul.f32 %v998_v18, %v1476_v16 }
 0x150   : > { %v527_v22 = vmul.f32 %v1476_v16, %v457_v19  ;;  %v991_v23 = vpop.f32.mrb[2].mxu0  ;;  %v999_v24 = vpop.f32.mrb[2].mxu1  ;;  %v535_v55 = vmul.f32 %v1476_v16, %v489_v21 }
 0x151   : > { %v460_v25 = vpop.f32.mrb[3].mxu0  ;;  %v492_v26 = vpop.f32.mrb[3].mxu1  ;;  %v530_v36 = vmul.f32 %v991_v23, %v1476_v16  ;;  %v552_v39 = vadd.f32 %v1481_v20, %v529_v29  ;;  %v538_v0 = vmul.f32 %v999_v24, %v1476_v16  ;;  %v560_v2 = vadd.f32 %v1481_v20, %v537_v62 }
 0x152   : > { %v528_v27 = vmul.f32 %v1476_v16, %v460_v25  ;;  %v550_v28 = vadd.f32 %v1481_v20, %v527_v22  ;;  %v558_v58 = vadd.f32 %v1481_v20, %v535_v55  ;;  %v536_v59 = vmul.f32 %v1476_v16, %v492_v26 }
 0x153   : > { %v568_v44 = vmax.f32 %v552_v39, 0.0  ;;  %v553_v45 = vadd.f32 %v1481_v20, %v530_v36  ;;  %v576_v4 = vmax.f32 %v560_v2, 0.0  ;;  %v561_v5 = vadd.f32 %v1481_v20, %v538_v0 }
 0x154   : > { %v566_v30 = vmax.f32 %v550_v28, 0.0  ;;  %v551_v31 = vadd.f32 %v1481_v20, %v528_v27  ;;  %v574_v61 = vmax.f32 %v558_v58, 0.0  ;;  %v559_v63 = vadd.f32 %v1481_v20, %v536_v59 }
 0x155   : > { %v569_v48 = vmax.f32 %v553_v45, 0.0  ;;  %v577_v8 = vmax.f32 %v561_v5, 0.0 }
 0x156   : > { %582 = vxpose.xlu0.b32.start [1/16] %v566_v30, 128  ;;  %v994_v32 = vpop.f32.mrb[4].mxu0  ;;  %v1002_v33 = vpop.f32.mrb[4].mxu1  ;;  %v567_v37 = vmax.f32 %v551_v31, 0.0  ;;  %v575_v1 = vmax.f32 %v559_v63, 0.0 }
 0x157   : > { %v473_v34 = vpop.f32.mrb[5].mxu0  ;;  %v505_v35 = vpop.f32.mrb[5].mxu1  ;;  %v533_v50 = vmul.f32 %v994_v32, %v1476_v16  ;;  %v541_v10 = vmul.f32 %v1002_v33, %v1476_v16 }
 0x158   : > { %v995_v38 = vpop.f32.mrb[6].mxu0  ;;  %v1003_v40 = vpop.f32.mrb[6].mxu1  ;;  %v531_v43 = vmul.f32 %v1476_v16, %v473_v34  ;;  %v539_v3 = vmul.f32 %v1476_v16, %v505_v35 }
 0x159   : > { %v476_v41 = vpop.f32.mrb[7].mxu0  ;;  %v508_v42 = vpop.f32.mrb[7].mxu1  ;;  %v534_v52 = vmul.f32 %v995_v38, %v1476_v16  ;;  %v556_v54 = vadd.f32 %v1481_v20, %v533_v50  ;;  %v542_v12 = vmul.f32 %v1003_v40, %v1476_v16  ;;  %v564_v14 = vadd.f32 %v1481_v20, %v541_v10 }
 0x15a   : > { %583 = vxpose.xlu0.b32.cont [2/16] %v567_v37, 128  ;;  %v554_v46 = vadd.f32 %v1481_v20, %v531_v43  ;;  %v532_v47 = vmul.f32 %v1476_v16, %v476_v41  ;;  %v562_v6 = vadd.f32 %v1481_v20, %v539_v3  ;;  %v540_v7 = vmul.f32 %v1476_v16, %v508_v42 }
 0x15b   : > { %v572_v56 = vmax.f32 %v556_v54, 0.0  ;;  %v557_v57 = vadd.f32 %v1481_v20, %v534_v52  ;;  %v580_v15 = vmax.f32 %v564_v14, 0.0  ;;  %v565_v17 = vadd.f32 %v1481_v20, %v542_v12 }
 0x15c   : > { %v570_v49 = vmax.f32 %v554_v46, 0.0  ;;  %v555_v51 = vadd.f32 %v1481_v20, %v532_v47  ;;  %v578_v9 = vmax.f32 %v562_v6, 0.0  ;;  %v563_v11 = vadd.f32 %v1481_v20, %v540_v7 }
 0x15d   : > { %v573_v60 = vmax.f32 %v557_v57, 0.0  ;;  %v581_v18 = vmax.f32 %v565_v17, 0.0 }
 0x15e   : > { %584 = vxpose.xlu0.b32.cont [3/16] %v568_v44, 128  ;;  %v571_v53 = vmax.f32 %v555_v51, 0.0  ;;  %v579_v13 = vmax.f32 %v563_v11, 0.0 }
 0x162   : > { %585 = vxpose.xlu0.b32.cont [4/16] %v569_v48, 128 }
 0x166   : > { %586 = vxpose.xlu0.b32.cont [5/16] %v570_v49, 128 }
 0x16a   : > { %587 = vxpose.xlu0.b32.cont [6/16] %v571_v53, 128 }
 0x16e   : > { %588 = vxpose.xlu0.b32.cont [7/16] %v572_v56, 128 }
 0x172   : > { %589 = vxpose.xlu0.b32.cont [8/16] %v573_v60, 128 }
 0x176   : > { %590 = vxpose.xlu0.b32.cont [9/16] %v574_v61, 128 }
 0x17a   : > { %591 = vxpose.xlu0.b32.cont [10/16] %v575_v1, 128 }
 0x17e   : > { %592 = vxpose.xlu0.b32.cont [11/16] %v576_v4, 128 }
 0x182   : > { %593 = vxpose.xlu0.b32.cont [12/16] %v577_v8, 128 }
 0x186   : > { %594 = vxpose.xlu0.b32.cont [13/16] %v578_v9, 128 }
 0x18a   : > { %595 = vxpose.xlu0.b32.cont [14/16] %v579_v13, 128 }
 0x18e   : > { %596 = vxpose.xlu0.b32.cont [15/16] %v580_v15, 128 }
 0x192   : > { %597 = vxpose.xlu0.b32.end [16/16] %v581_v18, 128 }
 0x1d6   : > { %v598_v19 = vpop.trf.xlu0 }
 0x1da   : > { %v599_v21 = vpop.trf.xlu0 }
 0x1db   : > { %v912_v22 = vpack.c.bf16 %v599_v21, %v598_v19 }
 0x1dd   : > { %913 = vst [vmem:[%s1517_s21] sm:$0xff] %v912_v22  }
 0x1de   : > { %v600_v16 = vpop.trf.xlu0 }
 0x1e2   : > { %v601_v23 = vpop.trf.xlu0 }
 0x1e3   : > { %v917_v24 = vpack.c.bf16 %v601_v23, %v600_v16 }
 0x1e5   : > { %949 = vst [vmem:[%s1517_s21 + $0x8] sm:$0xff] %v917_v24  }
 0x1e6   : > { %v602_v20 = vpop.trf.xlu0 }
 0x1ea   : > { %v603_v25 = vpop.trf.xlu0 }
 0x1eb   : > { %v922_v26 = vpack.c.bf16 %v603_v25, %v602_v20 }
 0x1ed   : > { %950 = vst [vmem:[%s1517_s21 + $0x10] sm:$0xff] %v922_v26  }
 0x1ee   : > { %v604_v27 = vpop.trf.xlu0 }
 0x1f2   : > { %v605_v28 = vpop.trf.xlu0 }
 0x1f3   : > { %v927_v29 = vpack.c.bf16 %v605_v28, %v604_v27 }
 0x1f5   : > { %951 = vst [vmem:[%s1517_s21 + $0x18] sm:$0xff] %v927_v29  }
 0x1f6   : > { %v606_v30 = vpop.trf.xlu0 }
 0x1fa   : > { %v607_v31 = vpop.trf.xlu0 }
 0x1fb   : > { %v932_v32 = vpack.c.bf16 %v607_v31, %v606_v30 }
 0x1fd   : > { %952 = vst [vmem:[%s1517_s21 + $0x20] sm:$0xff] %v932_v32  }
 0x1fe   : > { %v608_v33 = vpop.trf.xlu0 }
 0x202   : > { %v609_v34 = vpop.trf.xlu0 }
 0x203   : > { %v937_v35 = vpack.c.bf16 %v609_v34, %v608_v33 }
 0x205   : > { %953 = vst [vmem:[%s1517_s21 + $0x28] sm:$0xff] %v937_v35  }
 0x206   : > { %v610_v36 = vpop.trf.xlu0 }
 0x20a   : > { %v611_v37 = vpop.trf.xlu0 }
 0x20b   : > { %v942_v38 = vpack.c.bf16 %v611_v37, %v610_v36 }
 0x20d   : > { %954 = vst [vmem:[%s1517_s21 + $0x30] sm:$0xff] %v942_v38  }
 0x20e   : > { %v612_v39 = vpop.trf.xlu0 }
 0x212   : > { %v613_v40 = vpop.trf.xlu0 }
 0x213   : > { %v947_v41 = vpack.c.bf16 %v613_v40, %v612_v39 }
 0x215   : > { %955 = vst [vmem:[%s1517_s21 + $0x38] sm:$0xff] %v947_v41  }
 0x216   : > { %1184 = shalt.err (!%p1181_p5)
}
 0x217   : > { %s1185_s8 = scalar_lea.hbm %s1533_s9, 1024  ;;  %s1189_s27 = scalar_lea.hbm %s1587_s4, 2048 }
 0x218   : > { %p1186_p9 = scmp.ne.s32.totalorder %s1533_s9, %s1185_s8  ;;  %p1190_p3 = scmp.lt.u32.totalorder %s1533_s9, %s1587_s4 }
 0x219   : > { %p1191_p7 = scmp.lt.u32.totalorder %s1189_s27, %s1185_s8  ;;  %p1193_p4 = scmp.lt.u32.totalorder %s1185_s8, %s1533_s9 }
 0x21a   : > { %p1187_p1 = pnand %p1186_p9, %p1390_p10 }
 0x21b   : > { %p1192_p13 = por %p1191_p7, %p1190_p3 }
 0x21c   : > { %p1188_p2 = pneg %p1187_p1 }
 0x21d   : > { %p1194_p6 = por %p1193_p4, %p1192_p13 }
 0x21f   : > { %p1195_p8 = pnand %p1194_p6, %p1188_p2 }
 0x221   : > { %1198 = shalt.err (!%p1195_p8)
}
 0x222   : > { %s1264_s28 = smov 64   ;;  %s1265_s6 = smov 4  }
 0x223   : > { %1026 = dma.vmem_to_hbm [thread:$0]  (%p1390_p10), %s1528_s22, 1024, %s1533_s9, %s695_s11, %s1264_s28, %s1264_s28, %s1265_s6  }
 0x224 PF: > { %s726_s29 = sand.u32 1, %s1237_s15   ;;  %p1605_p12 = scmp.ne.s32.totalorder %s1595_s26, 0 }
 0x225   : > { %p1606_p11 = scmp.ge.s32.totalorder %s1257_s20, 2  ;;  %s727_s13 = scalar_lea.sflag [#allocation4], %s726_s29 }
 0x227   : > { %p1037_p0 = pnand %p1606_p11, %p1605_p12 }
 0x229   : > { %1232 = dma.done.wait (!%p1037_p0), %s727_s13, 1024  }
 0x22a   : > { %1234 = vsyncadd (!%p1037_p0), %s727_s13, 4294966272  ;;  %s21_s20 = sadd.s32 1, %s1257_s20   ;;  %s1607_s15 = smov %s1241_s16 }
 0x22b   : > { %p18_p5 = scmp.ge.s32.totalorder %s21_s20, 4   ;;  %s1608_s16 = smov %s1245_s17 }
 0x22c   : > { %s1609_s17 = smov %s1399_s10  ;;  %s1610_s18 = smov %s1253_s19 }
 0x22d   : > { %s1611_s19 = smov %s1613_s5  ;;  %20 = sbr.rel (!%p18_p5) target bundleno = 7 (0x7), region = 92 }
 0x234   :  { %732 = vsyncpa [#allocation3], 1 }
 0x235   :  { %734 = vsyncpa [#allocation3 + $0x1], 1 }
 0x236   :  { %735 = vsyncpa [#allocation6], 1 }
 0x237   :  { %736 = vsyncpa [#allocation4], 1 }
 0x238   :  { %738 = vsyncpa [#allocation4 + $0x1], 1 }

</bundles_post_ra>
